<compile_context>
chip_gen: v6e
topology: v6e:2x2x1
jax: 0.10.0
libtpu: 0.0.40
codegen_flags: <defaults>
</compile_context>

<pallas_src>
import functools

import jax
import jax.numpy as jnp
from jax.experimental import pallas as pl
from jax.experimental.pallas import tpu as pltpu


M_HEADS = 5  # MutanLayer(dim, 5)


def _round_up(x, m):
    return (x + m - 1) // m * m


# ---------------------------------------------------------------------------
# Kernel 1: MUTAN fusion, one head per grid step, resident accumulator output.
#   x = relu( sum_i relu(e @ W1_i + b1_i) * relu(r @ W2_i + b2_i) )
# ---------------------------------------------------------------------------
def mutan_fusion_kernel(e_ref, r_ref, w1_ref, b1_ref, w2_ref, b2_ref, x_ref):
    i = pl.program_id(0)

    @pl.when(i == 0)
    def _():
        x_ref[...] = jnp.zeros_like(x_ref)

    # All elementwise math in f32 (v5e VPU/EUP have no bf16 path).
    e = e_ref[...].astype(jnp.float32)                         # (B, D)
    r = r_ref[...].astype(jnp.float32)                         # (B, D)

    x1 = jnp.dot(e, w1_ref[...].astype(jnp.float32),
                 preferred_element_type=jnp.float32)           # (B, D)
    x1 = jnp.maximum(x1 + b1_ref[...].astype(jnp.float32), 0.0)
    x2 = jnp.dot(r, w2_ref[...].astype(jnp.float32),
                 preferred_element_type=jnp.float32)           # (B, D)
    x2 = jnp.maximum(x2 + b2_ref[...].astype(jnp.float32), 0.0)

    x_ref[...] += x1 * x2                                      # head accumulation

    @pl.when(i == pl.num_programs(0) - 1)
    def _():
        x_ref[...] = jnp.maximum(x_ref[...], 0.0)              # final ReLU


# ---------------------------------------------------------------------------
# Kernel 2: score one lane-dense entity tile: sigmoid(x @ E_T[:, tile]).
# ---------------------------------------------------------------------------
def mutan_score_kernel(x_ref, et_ref, out_ref):
    et = et_ref[...].astype(jnp.float32)                       # (D, tile) (bf16 ok)
    scores = jnp.dot(x_ref[...], et,
                     preferred_element_type=jnp.float32)       # (B, tile)
    out_ref[...] = jax.nn.sigmoid(scores)


# ---------------------------------------------------------------------------
# Wrappers
# ---------------------------------------------------------------------------
def prepare_entity_table(ent_emb, dtype=None):
    """One-time (init-time) prep of the scoring stream: lane-dense (D, N_ent).

    Optionally downcast (e.g. jnp.bfloat16) to halve the HBM bytes streamed by
    the memory-bound scoring loop.  NOT part of the per-call forward.
    """
    ent_t = jnp.swapaxes(ent_emb, 0, 1)
    if dtype is not None:
        ent_t = ent_t.astype(dtype)
    return ent_t


@functools.partial(jax.jit, static_argnames=("tile_n", "min_grid_steps"))
def mutan_forward(batch_inputs, ent_emb, rel_emb, ent_T, w1, b1, w2, b2,
                  *, tile_n=8192, min_grid_steps=8):
    """Pallas implementation of Mutan.forward.

    batch_inputs : (B, 2) int32  [head_id, relation_id]
    ent_emb      : (N_ent, D)    row-major table (for embedding gathers)
    rel_emb      : (2*N_rel, D)
    ent_T        : (D, N_ent)    persistent lane-dense table from prepare_entity_table
    w1, w2       : (M, D, D)     per-head Linear weights, stored (in, out)
    b1, b2       : (M, 1, D)
    returns      : (B, N_ent) float32 sigmoid scores
    """
    head = batch_inputs[:, 0]
    relation = batch_inputs[:, 1]
    e = jnp.take(ent_emb, head, axis=0)          # embedding lookups (XLA glue)
    r = jnp.take(rel_emb, relation, axis=0)

    B, D = e.shape
    N_ent = ent_emb.shape[0]
    M = w1.shape[0]

    # --- 1) fusion kernel: (e, r) -> x  (B, D) f32, grid over heads ---------
    x = pl.pallas_call(
        mutan_fusion_kernel,
        out_shape=jax.ShapeDtypeStruct((B, D), jnp.float32),
        grid_spec=pltpu.PrefetchScalarGridSpec(
            num_scalar_prefetch=0,
            grid=(M,),
            in_specs=[
                pl.BlockSpec((B, D), lambda i: (0, 0)),            # e (resident-ish, tiny)
                pl.BlockSpec((B, D), lambda i: (0, 0)),            # r
                pl.BlockSpec((None, D, D), lambda i: (i, 0, 0)),   # W1[i]  (D, D)
                pl.BlockSpec((None, 1, D), lambda i: (i, 0, 0)),   # b1[i]  (1, D)
                pl.BlockSpec((None, D, D), lambda i: (i, 0, 0)),   # W2[i]  (D, D)
                pl.BlockSpec((None, 1, D), lambda i: (i, 0, 0)),   # b2[i]  (1, D)
            ],
            out_specs=pl.BlockSpec((B, D), lambda i: (0, 0)),      # resident accumulator
        ),
        compiler_params=pltpu.CompilerParams(
            dimension_semantics=("arbitrary",),                    # cross-step accumulation
            vmem_limit_bytes=32 * 1024 * 1024),
    )(e, r, w1, b1, w2, b2)

    # --- 2) scoring kernel: stream lane-dense entity tiles (D, tile_eff) ----
    # Wide tiles to amortize per-step overhead, but capped so the parallel
    # grid keeps >= min_grid_steps steps (v7x megacore sharding). Ragged cdiv
    # grid: no table pad, no output slice (Pallas masks the ragged last tile).
    tile_cap = _round_up(pl.cdiv(N_ent, min_grid_steps), 128)
    tile_eff = max(128, min(_round_up(tile_n, 128), tile_cap))
    grid = (pl.cdiv(N_ent, tile_eff),)

    out = pl.pallas_call(
        mutan_score_kernel,
        out_shape=jax.ShapeDtypeStruct((B, N_ent), jnp.float32),
        grid_spec=pltpu.PrefetchScalarGridSpec(
            num_scalar_prefetch=0,
            grid=grid,
            in_specs=[
                pl.BlockSpec((B, D), lambda j: (0, 0)),            # fused x (resident)
                pl.BlockSpec((D, tile_eff), lambda j: (0, j)),     # entity tile (lane-dense)
            ],
            out_specs=pl.BlockSpec((B, tile_eff), lambda j: (0, j)),
        ),
        compiler_params=pltpu.CompilerParams(
            dimension_semantics=("parallel",),                     # no cross-step state
            vmem_limit_bytes=32 * 1024 * 1024),
    )(x, ent_T)

    return out


def mutan_reference(batch_inputs, ent_emb, rel_emb, w1, b1, w2, b2):
    """Pure-JAX reference mirroring the PyTorch forward (eval mode)."""
    e = ent_emb[batch_inputs[:, 0]]
    r = rel_emb[batch_inputs[:, 1]]
    acc = jnp.zeros_like(e)
    for i in range(w1.shape[0]):
        x1 = jax.nn.relu(e @ w1[i] + b1[i])
        x2 = jax.nn.relu(r @ w2[i] + b2[i])
        acc = acc + x1 * x2
    x = jax.nn.relu(acc)
    return jax.nn.sigmoid(x @ ent_emb.T)


if __name__ == "__main__":
    key = jax.random.PRNGKey(0)

    # small synthetic problem sizes
    N_ENT = 300        # deliberately NOT a multiple of 128 -> ragged last tile
    N_REL = 8          # relation table holds 2*N_REL rows
    D = 32             # args.dim == args.r_dim
    B = 8              # batch size (multiple of 8 for f32 sublane packing)

    ks = jax.random.split(key, 8)
    # xavier-normal-ish deterministic init for the embedding tables
    ent_std = (2.0 / (N_ENT + D)) ** 0.5
    rel_std = (2.0 / (2 * N_REL + D)) ** 0.5
    ent_emb = ent_std * jax.random.normal(ks[0], (N_ENT, D), jnp.float32)
    rel_emb = rel_std * jax.random.normal(ks[1], (2 * N_REL, D), jnp.float32)

    # MutanLayer(dim, 5): 5 Linear(D, D) per modality, stored (in, out)
    lin_std = (1.0 / D) ** 0.5
    w1 = lin_std * jax.random.normal(ks[2], (M_HEADS, D, D), jnp.float32)
    b1 = lin_std * jax.random.normal(ks[3], (M_HEADS, 1, D), jnp.float32)
    w2 = lin_std * jax.random.normal(ks[4], (M_HEADS, D, D), jnp.float32)
    b2 = lin_std * jax.random.normal(ks[5], (M_HEADS, 1, D), jnp.float32)

    head = jax.random.randint(ks[6], (B,), 0, N_ENT, jnp.int32)
    rel = jax.random.randint(ks[7], (B,), 0, 2 * N_REL, jnp.int32)
    batch_inputs = jnp.stack([head, rel], axis=1)  # (B, 2)

    ref = mutan_reference(batch_inputs, ent_emb, rel_emb, w1, b1, w2, b2)

    # f32-streamed table (tight tolerance)
    ent_T = prepare_entity_table(ent_emb)          # one-time, outside the hot path
    out = mutan_forward(batch_inputs, ent_emb, rel_emb, ent_T, w1, b1, w2, b2)
    out = jax.block_until_ready(out)
    assert out.shape == (B, N_ENT)
    assert jnp.allclose(out, ref, atol=2e-5, rtol=1e-5), "f32 mismatch vs reference"

    # bf16-streamed table: halves HBM bytes of the memory-bound scoring loop
    # (biggest relative win on v5e); relaxed tolerance vs the f32 reference.
    ent_T_bf16 = prepare_entity_table(ent_emb, dtype=jnp.bfloat16)
    out_bf16 = mutan_forward(batch_inputs, ent_emb, rel_emb, ent_T_bf16,
                             w1, b1, w2, b2)
    out_bf16 = jax.block_until_ready(out_bf16)
    assert jnp.allclose(out_bf16, ref, atol=2e-2, rtol=2e-2), "bf16 mismatch vs reference"

    print("KERNEL_OK")
</pallas_src>

<mosaic_0001>
module attributes {stable_mosaic.version = 11 : i64} {
  func.func @mutan_score_kernel(%arg0: i32, %arg1: memref<8x32xf32, #tpu.memory_space<vmem>>, %arg2: memref<32x128xf32, #tpu.memory_space<vmem>>, %arg3: memref<8x128xf32, #tpu.memory_space<vmem>>) attributes {dimension_semantics = [#tpu.dimension_semantics<parallel>], iteration_bounds = array<i64: 3>, scalar_prefetch = 0 : i64, scratch_operands = 0 : i64, tpu.core_type = #tpu.core_type<tc>, window_params = [{pipeline_mode = #tpu.pipeline_mode<synchronous>, transform_indices = @transform_0, window_bounds = array<i64: 8, 32>}, {transform_indices = @transform_1, window_bounds = array<i64: 32, 128>}, {transform_indices = @transform_2, window_bounds = array<i64: 8, 128>}]} {
    %c0 = arith.constant 0 : index
    %c0_0 = arith.constant 0 : index
    %0 = vector.load %arg2[%c0, %c0_0] : memref<32x128xf32, #tpu.memory_space<vmem>>, vector<32x128xf32>
    %c0_1 = arith.constant 0 : index
    %c0_2 = arith.constant 0 : index
    %1 = vector.load %arg1[%c0_1, %c0_2] : memref<8x32xf32, #tpu.memory_space<vmem>>, vector<8x32xf32>
    %cst = arith.constant dense<0.000000e+00> : vector<8x128xf32>
    %2 = tpu.matmul %1, %0, %cst {dimension_numbers = #tpu.dot_dimension_numbers<[1], [0], [0], [1], [0, 0, 1, 1], [], []>} : vector<8x32xf32>, vector<32x128xf32>, vector<8x128xf32> -> vector<8x128xf32>
    %3 = arith.negf %2 : vector<8x128xf32>
    %4 = math.exp %3 : vector<8x128xf32>
    %cst_3 = arith.constant 1.000000e+00 : f32
    %5 = vector.broadcast %cst_3 : f32 to vector<8x128xf32>
    %6 = arith.addf %5, %4 : vector<8x128xf32>
    %7 = arith.divf %5, %6 : vector<8x128xf32>
    %c0_4 = arith.constant 0 : index
    %c0_5 = arith.constant 0 : index
    %8 = vector.load %arg3[%c0_4, %c0_5] : memref<8x128xf32, #tpu.memory_space<vmem>>, vector<8x128xf32>
    tpu.vector_store %arg3[%c0_4, %c0_5], %7 {strides = array<i32>} : memref<8x128xf32, #tpu.memory_space<vmem>>, vector<8x128xf32>,
    return
  }
  func.func @transform_0(%arg0: i32) -> (i32, i32) {
    %c0_i32 = arith.constant 0 : i32
    %c0_i32_0 = arith.constant 0 : i32
    %c0_i32_1 = arith.constant 0 : i32
    return %c0_i32, %c0_i32_0 : i32, i32
  }
  func.func @transform_1(%arg0: i32) -> (i32, i32) {
    %c0_i32 = arith.constant 0 : i32
    %c0_i32_0 = arith.constant 0 : i32
    return %c0_i32, %arg0 : i32, i32
  }
  func.func @transform_2(%arg0: i32) -> (i32, i32) {
    %c0_i32 = arith.constant 0 : i32
    %c0_i32_0 = arith.constant 0 : i32
    return %c0_i32, %arg0 : i32, i32
  }
}

module attributes {stable_mosaic.version = 11 : i64} {
  func.func @mutan_fusion_kernel(%arg0: i32, %arg1: memref<8x32xf32, #tpu.memory_space<vmem>>, %arg2: memref<8x32xf32, #tpu.memory_space<vmem>>, %arg3: memref<1x32x32xf32, #tpu.memory_space<vmem>>, %arg4: memref<1x1x32xf32, #tpu.memory_space<vmem>>, %arg5: memref<1x32x32xf32, #tpu.memory_space<vmem>>, %arg6: memref<1x1x32xf32, #tpu.memory_space<vmem>>, %arg7: memref<8x32xf32, #tpu.memory_space<vmem>>) attributes {dimension_semantics = [#tpu.dimension_semantics<arbitrary>], iteration_bounds = array<i64: 5>, scalar_prefetch = 0 : i64, scratch_operands = 0 : i64, tpu.core_type = #tpu.core_type<tc>, window_params = [{pipeline_mode = #tpu.pipeline_mode<synchronous>, transform_indices = @transform_0, window_bounds = array<i64: 8, 32>}, {pipeline_mode = #tpu.pipeline_mode<synchronous>, transform_indices = @transform_1, window_bounds = array<i64: 8, 32>}, {transform_indices = @transform_2, window_bounds = array<i64: 1, 32, 32>}, {transform_indices = @transform_3, window_bounds = array<i64: 1, 1, 32>}, {transform_indices = @transform_4, window_bounds = array<i64: 1, 32, 32>}, {transform_indices = @transform_5, window_bounds = array<i64: 1, 1, 32>}, {pipeline_mode = #tpu.pipeline_mode<synchronous>, transform_indices = @transform_6, window_bounds = array<i64: 8, 32>}]} {
    %c0_i32 = arith.constant 0 : i32
    %0 = arith.cmpi eq, %arg0, %c0_i32 : i32
    %1 = arith.extui %0 : i1 to i32
    %c0_i32_0 = arith.constant 0 : i32
    %2 = arith.cmpi ne, %1, %c0_i32_0 : i32
    scf.if %2 {
      %cst_24 = arith.constant 0.000000e+00 : f32
      %30 = vector.broadcast %cst_24 : f32 to vector<8x32xf32>
      %c0_25 = arith.constant 0 : index
      %c0_26 = arith.constant 0 : index
      %31 = vector.load %arg7[%c0_25, %c0_26] : memref<8x32xf32, #tpu.memory_space<vmem>>, vector<8x32xf32>
      tpu.vector_store %arg7[%c0_25, %c0_26], %30 {strides = array<i32>} : memref<8x32xf32, #tpu.memory_space<vmem>>, vector<8x32xf32>,
    } else {
    }
    %c0 = arith.constant 0 : index
    %c0_1 = arith.constant 0 : index
    %3 = vector.load %arg1[%c0, %c0_1] : memref<8x32xf32, #tpu.memory_space<vmem>>, vector<8x32xf32>
    %c0_2 = arith.constant 0 : index
    %c0_3 = arith.constant 0 : index
    %4 = vector.load %arg2[%c0_2, %c0_3] : memref<8x32xf32, #tpu.memory_space<vmem>>, vector<8x32xf32>
    %c0_4 = arith.constant 0 : index
    %c0_5 = arith.constant 0 : index
    %c0_6 = arith.constant 0 : index
    %5 = vector.load %arg3[%c0_4, %c0_5, %c0_6] : memref<1x32x32xf32, #tpu.memory_space<vmem>>, vector<1x32x32xf32>
    %6 = vector.shape_cast %5 : vector<1x32x32xf32> to vector<32x32xf32>
    %cst = arith.constant dense<0.000000e+00> : vector<8x32xf32>
    %7 = tpu.matmul %3, %6, %cst {dimension_numbers = #tpu.dot_dimension_numbers<[1], [0], [0], [1], [0, 0, 1, 1], [], []>} : vector<8x32xf32>, vector<32x32xf32>, vector<8x32xf32> -> vector<8x32xf32>
    %c0_7 = arith.constant 0 : index
    %c0_8 = arith.constant 0 : index
    %c0_9 = arith.constant 0 : index
    %8 = vector.load %arg4[%c0_7, %c0_8, %c0_9] : memref<1x1x32xf32, #tpu.memory_space<vmem>>, vector<1x1x32xf32>
    %9 = vector.shape_cast %8 : vector<1x1x32xf32> to vector<1x32xf32>
    %10 = vector.broadcast %9 : vector<1x32xf32> to vector<8x32xf32>
    %11 = arith.addf %7, %10 : vector<8x32xf32>
    %cst_10 = arith.constant 0.000000e+00 : f32
    %12 = vector.broadcast %cst_10 : f32 to vector<8x32xf32>
    %13 = arith.maximumf %11, %12 : vector<8x32xf32>
    %c0_11 = arith.constant 0 : index
    %c0_12 = arith.constant 0 : index
    %c0_13 = arith.constant 0 : index
    %14 = vector.load %arg5[%c0_11, %c0_12, %c0_13] : memref<1x32x32xf32, #tpu.memory_space<vmem>>, vector<1x32x32xf32>
    %15 = vector.shape_cast %14 : vector<1x32x32xf32> to vector<32x32xf32>
    %cst_14 = arith.constant dense<0.000000e+00> : vector<8x32xf32>
    %16 = tpu.matmul %4, %15, %cst_14 {dimension_numbers = #tpu.dot_dimension_numbers<[1], [0], [0], [1], [0, 0, 1, 1], [], []>} : vector<8x32xf32>, vector<32x32xf32>, vector<8x32xf32> -> vector<8x32xf32>
    %c0_15 = arith.constant 0 : index
    %c0_16 = arith.constant 0 : index
    %c0_17 = arith.constant 0 : index
    %17 = vector.load %arg6[%c0_15, %c0_16, %c0_17] : memref<1x1x32xf32, #tpu.memory_space<vmem>>, vector<1x1x32xf32>
    %18 = vector.shape_cast %17 : vector<1x1x32xf32> to vector<1x32xf32>
    %19 = vector.broadcast %18 : vector<1x32xf32> to vector<8x32xf32>
    %20 = arith.addf %16, %19 : vector<8x32xf32>
    %cst_18 = arith.constant 0.000000e+00 : f32
    %21 = vector.broadcast %cst_18 : f32 to vector<8x32xf32>
    %22 = arith.maximumf %20, %21 : vector<8x32xf32>
    %c0_19 = arith.constant 0 : index
    %c0_20 = arith.constant 0 : index
    %23 = vector.load %arg7[%c0_19, %c0_20] : memref<8x32xf32, #tpu.memory_space<vmem>>, vector<8x32xf32>
    %24 = arith.mulf %13, %22 : vector<8x32xf32>
    %25 = arith.addf %23, %24 : vector<8x32xf32>
    %c0_21 = arith.constant 0 : index
    %c0_22 = arith.constant 0 : index
    %26 = vector.load %arg7[%c0_21, %c0_22] : memref<8x32xf32, #tpu.memory_space<vmem>>, vector<8x32xf32>
    tpu.vector_store %arg7[%c0_21, %c0_22], %25 {strides = array<i32>} : memref<8x32xf32, #tpu.memory_space<vmem>>, vector<8x32xf32>,
    %c4_i32 = arith.constant 4 : i32
    %27 = arith.cmpi eq, %arg0, %c4_i32 : i32
    %28 = arith.extui %27 : i1 to i32
    %c0_i32_23 = arith.constant 0 : i32
    %29 = arith.cmpi ne, %28, %c0_i32_23 : i32
    scf.if %29 {
      %c0_24 = arith.constant 0 : index
      %c0_25 = arith.constant 0 : index
      %30 = vector.load %arg7[%c0_24, %c0_25] : memref<8x32xf32, #tpu.memory_space<vmem>>, vector<8x32xf32>
      %cst_26 = arith.constant 0.000000e+00 : f32
      %31 = vector.broadcast %cst_26 : f32 to vector<8x32xf32>
      %32 = arith.maximumf %30, %31 : vector<8x32xf32>
      %c0_27 = arith.constant 0 : index
      %c0_28 = arith.constant 0 : index
      %33 = vector.load %arg7[%c0_27, %c0_28] : memref<8x32xf32, #tpu.memory_space<vmem>>, vector<8x32xf32>
      tpu.vector_store %arg7[%c0_27, %c0_28], %32 {strides = array<i32>} : memref<8x32xf32, #tpu.memory_space<vmem>>, vector<8x32xf32>,
    } else {
    }
    return
  }
  func.func @transform_0(%arg0: i32) -> (i32, i32) {
    %c0_i32 = arith.constant 0 : i32
    %c0_i32_0 = arith.constant 0 : i32
    %c0_i32_1 = arith.constant 0 : i32
    return %c0_i32, %c0_i32_0 : i32, i32
  }
  func.func @transform_1(%arg0: i32) -> (i32, i32) {
    %c0_i32 = arith.constant 0 : i32
    %c0_i32_0 = arith.constant 0 : i32
    %c0_i32_1 = arith.constant 0 : i32
    return %c0_i32, %c0_i32_0 : i32, i32
  }
  func.func @transform_2(%arg0: i32) -> (i32, i32, i32) {
    %c0_i32 = arith.constant 0 : i32
    %c0_i32_0 = arith.constant 0 : i32
    %c0_i32_1 = arith.constant 0 : i32
    return %arg0, %c0_i32, %c0_i32_0 : i32, i32, i32
  }
  func.func @transform_3(%arg0: i32) -> (i32, i32, i32) {
    %c0_i32 = arith.constant 0 : i32
    %c0_i32_0 = arith.constant 0 : i32
    %c0_i32_1 = arith.constant 0 : i32
    return %arg0, %c0_i32, %c0_i32_0 : i32, i32, i32
  }
  func.func @transform_4(%arg0: i32) -> (i32, i32, i32) {
    %c0_i32 = arith.constant 0 : i32
    %c0_i32_0 = arith.constant 0 : i32
    %c0_i32_1 = arith.constant 0 : i32
    return %arg0, %c0_i32, %c0_i32_0 : i32, i32, i32
  }
  func.func @transform_5(%arg0: i32) -> (i32, i32, i32) {
    %c0_i32 = arith.constant 0 : i32
    %c0_i32_0 = arith.constant 0 : i32
    %c0_i32_1 = arith.constant 0 : i32
    return %arg0, %c0_i32, %c0_i32_0 : i32, i32, i32
  }
  func.func @transform_6(%arg0: i32) -> (i32, i32) {
    %c0_i32 = arith.constant 0 : i32
    %c0_i32_0 = arith.constant 0 : i32
    %c0_i32_1 = arith.constant 0 : i32
    return %c0_i32, %c0_i32_0 : i32, i32
  }
}

</mosaic_0001>

<bundles_post_ra>
// kernel: mutan_forward.3
= control target key start
LH: loop header
LB: loop body
LE: loop exit
PB: predicated region body
PF: predicated region fallthrough
CT: control target
= control target key end

     0   :  { %7 = vsyncpa [#allocation4], 0  ;;  %s612_s0 = inlined_call_operand.vmem [shape: f32[8,32], index: 0, kind: input, shape index: {}]   ;;  %s613_s1 = inlined_call_operand.vmem [shape: f32[32,300], index: 1, kind: input, shape index: {}]   ;;  %s614_s2 = inlined_call_operand.hbm [shape: f32[8,300], index: 2, kind: output, shape index: {}]  }
   0x1   :  { %9 = vsyncpa [#allocation4 + $0x1], 0  ;;  %s509_s9 = smov 0   ;;  %s511_s10 = smov 0  }
   0x2   :  { %s513_s11 = smov 0   ;;  %s515_s12 = smov 0  }
   0x3 LB: > { %s353_s13 = sadd.s32 4294967295, %s489_s12   ;;  %s354_s14 = sadd.s32 4294967294, %s489_s12   ;;  %s489_s12 = sphi %s515_s12, %s620_s12   ;;  %s485_s11 = sphi %s513_s11, %s619_s11   ;;  %s481_s10 = sphi %s511_s10, %s618_s10   ;;  %s477_s9 = sphi %s509_s9, %s617_s9  }
   0x4   : > { %s532_s15 = sadd.s32 1, %s489_s12   ;;  %s43_s16 = sadd.s32 1, %s485_s11 }
   0x5   : > { %s40_s17 = ssub.s32 %s489_s12, %s532_s15  ;;  %p50_p0 = scmp.ne.s32.totalorder %s485_s11, %s481_s10 }
   0x6   : > { %p41_p1 = scmp.eq.s32.totalorder %s40_s17, 0  ;;  %p51_p2 = scmp.eq.s32.totalorder %s489_s12, 0 }
   0x7   : > { %p80_p3 = scmp.eq.s32.totalorder %s353_s13, 2  ;;  %p85_p4 = scmp.ne.s32.totalorder %s481_s10, %s477_s9 }
   0x8   : > { %s545_s18 = scalar_select %p41_p1, %s485_s11, %s43_s16  }
   0x9   : > { %p52_p5 = por %p51_p2, %p50_p0  ;;  %p547_p6 = por %p80_p3, %p50_p0 }
   0xa   : > { %p86_p7 = scmp.eq.s32.totalorder %s354_s14, 2  ;;  %p356_p9 = scmp.ge.s32.totalorder %s489_s12, 3 }
   0xc   : > { %p551_p8 = por %p86_p7, %p85_p4  ;;  %105 = sbr.rel (%p356_p9) target bundleno = 23 (0x17), region = 20 }
  0x11   : > { %108 = sbr.rel (!%p52_p5) target bundleno = 23 (0x17), region = 24  ;;  %s110_s21 = sand.u32 (%p52_p5), 1, %s485_s11  }
  0x12   : > { %s358_s22 = sshll.u32 (%p52_p5), %s489_s12, 3  ;;  %s357_s23 = sshll.u32 (%p52_p5), %s110_s21, 5 }
  0x13   : > { %s114_s26 = scalar_lea.vmem (%p52_p5), %s613_s1, %s358_s22  ;;  %s112_s27 = scalar_lea.vmem (%p52_p5), [#allocation2], %s357_s23 }
  0x14   : > { %v149_v0 = vld [vmem:[%s114_s26] sm:$0xff] (%p52_p5)  ;;  %v151_v1 = vld [vmem:[%s114_s26 + $0x18] sm:$0xff] (%p52_p5)  ;;  %v153_v2 = vld [vmem:[%s114_s26 + $0x30] sm:$0xff] (%p52_p5) }
  0x15   : > { %150 = vst [vmem:[%s112_s27] sm:$0xff] (%p52_p5), %v149_v0  ;;  %152 = vst [vmem:[%s112_s27 + $0x8] sm:$0xff] (%p52_p5), %v151_v1  ;;  %v155_v3 = vld [vmem:[%s114_s26 + $0x48] sm:$0xff] (%p52_p5) }
  0x16   : > { %154 = vst [vmem:[%s112_s27 + $0x10] sm:$0xff] %v153_v2  ;;  %156 = vst [vmem:[%s112_s27 + $0x18] sm:$0xff] %v155_v3 }
  0x17 PF: > { %p359_p10 = scmp.ge.s32.totalorder %s489_s12, 1  ;;  %p161_p11 = scmp.lt.s32.totalorder %s489_s12, 4 }
  0x19   : > { %p162_p12 = pnand %p359_p10, %p161_p11 }
  0x1a   : > { %s564_s28 = sand.u32 (!%p162_p12), 1, %s481_s10   ;;  %s365_s6 = sshll.u32 (!%p162_p12), %s353_s13, 7 }
  0x1b   : > { %165 = sbr.rel (%p162_p12) target bundleno = 279 (0x117), region = 62  ;;  %s360_s29 = sshll.u32 (!%p162_p12), %s564_s28, 5 }
  0x1c   : > { %s170_s30 = scalar_lea.vmem (!%p162_p12), [#allocation2], %s360_s29  ;;  %s361_s5 = sshll.u32 (!%p162_p12), %s564_s28, 3 }
  0x1d   : > { %s188_s7 = scalar_lea.vmem (!%p162_p12), [#allocation3], %s361_s5  ;;  %s576_s17 = scalar_lea.hbm (!%p162_p12), %s614_s2, %s365_s6 }
  0x1e   : > { %s289_s8 = sshll.u32 (!%p162_p12), %s188_s7, 4  ;;  %s276_s21 = scalar_lea.sflag (!%p162_p12), [#allocation4], %s564_s28  ;;  %s290_s8 = int_to_ptr.vmem [resolvable:$true] %s289_s8 }
  0x1f   : > { %s429_s22 = scalar_lea.vmem (!%p162_p12), %s290_s8, 128  ;;  %s493_s23 = smov (!%p162_p12), [#allocation3]  }
  0x20   : > { %v491_v4 = vmov 0.0   ;;  %vm492_vm0 = vmmov 0   ;;  %v192_v5 = vld [vmem:[%s170_s30 + $0x18] sm:$0xff]  ;;  %v191_v6 = vld [vmem:[%s170_s30 + $0x10] sm:$0xff]  ;;  %v190_v7 = vld [vmem:[%s170_s30 + $0x8] sm:$0xff]  ;;  %vm194_vm1 = vcmask 261120   ;;  %p430_p13 = scmp.ne.s32.totalorder %s290_s8, %s429_s22 }
  0x21   : > { %373 = vmatprep.subr.mxu0 %v491_v4  ;;  %381 = vmatprep.mubr.msk.f32.mxu0 %vm492_vm0, %v491_v4  ;;  %v189_v8 = vld [vmem:[%s170_s30] sm:$0xff]  ;;  %s433_s24 = sshll.u32 %s493_s23, 4  ;;  %s434_s24 = int_to_ptr.vmem [resolvable:$false] %s433_s24 }
  0x22   : > { %374 = vmatpush3.msra.mxu0 %v192_v5  ;;  %v193_v9 = vld [vmem:[%s612_s0] sm:$0xff]  ;;  %p431_p0 = pnand %p430_p13, %p547_p6  ;;  %s435_s13 = scalar_lea.vmem %s434_s24, 256 }
  0x23   : > { %375 = vmatprep.subr.mxu0 %v491_v4  ;;  %p436_p2 = scmp.lt.s32.totalorder %s290_s8, %s434_s24  ;;  %p437_p3 = scmp.lt.s32.totalorder %s435_s13, %s429_s22 }
  0x24   : > { %376 = vmatpush3.msra.mxu0 %v191_v6  ;;  %p432_p1 = pneg %p431_p0 }
  0x25   : > { %377 = vmatprep.subr.mxu0 %v491_v4  ;;  %p438_p4 = por %p437_p3, %p436_p2 }
  0x26   : > { %378 = vmatpush3.msra.mxu0 %v190_v7 }
  0x27   : > { %379 = vmatprep.subr.mxu0 %v491_v4  ;;  %p439_p5 = pnand %p438_p4, %p432_p1 }
  0x28   : > { %380 = vmatpush3.msra.mxu0 %v189_v8 }
  0x29   : > { %382 = vmatmul.mubr.msk.f32.vlgmr.msra.gmra.mxu0 %vm194_vm1, %v193_v9 }
  0xe9   : > { %v264_v10 = vpop.f32.mrf.mxu0 }
  0xea   : > { %v363_v11 = vmul.f32 -1.442695, %v264_v10 }
  0xeb   : > { %v383_v12 = vpop.f32.mrf.mxu0 }
  0xec   : > { %425 = vpow2.f32 %v363_v11 }
  0xf9   : > { %v426_v13 = vpop.eup %425 }
  0xfa   : > { %v271_v14 = vadd.f32 1.0, %v426_v13 }
  0xfc   : > { %427 = vrcp.f32 %v271_v14 }
 0x109   : > { %v428_v15 = vpop.eup %427 }
 0x10a   : > { %274 = vst [vmem:[%s188_s7] sm:$0xff] %v428_v15 }
 0x10b   : > { %442 = shalt.err (!%p439_p5)
}
 0x10c   : > { %s443_s25 = scalar_lea.hbm %s576_s17, 128  ;;  %s447_s28 = scalar_lea.hbm %s614_s2, 384 }
 0x10d   : > { %p444_p7 = scmp.ne.s32.totalorder %s576_s17, %s443_s25  ;;  %p448_p11 = scmp.lt.s32.totalorder %s576_s17, %s614_s2 }
 0x10e   : > { %p449_p12 = scmp.lt.s32.totalorder %s447_s28, %s443_s25 }
 0x10f   : > { %p445_p9 = pnand %p444_p7, %p547_p6 }
 0x110   : > { %p450_p13 = por %p449_p12, %p448_p11 }
 0x111   : > { %p446_p10 = pneg %p445_p9 }
 0x113   : > { %p451_p0 = pnand %p450_p13, %p446_p10 }
 0x115   : > { %454 = shalt.err (!%p451_p0)
}
 0x116   : > { %384 = dma.vmem_to_hbm [thread:$0]  (%p547_p6), %s290_s8, 128, %s576_s17, %s276_s21  }
 0x117 PF: > { %p390_p1 = scmp.ge.s32.totalorder %s489_s12, 2  ;;  %s301_s3 = sand.u32 1, %s477_s9  }
 0x118   : > { %s302_s4 = scalar_lea.sflag [#allocation4], %s301_s3 }
 0x119   : > { %p387_p2 = pnand %p390_p1, %p551_p8 }
 0x11b   : > { %p388_p3 = pneg %p387_p2 }
 0x11d   : > { %472 = dma.done.wait (%p388_p3), %s302_s4, 128  }
 0x11e   : > { %474 = vsyncadd (%p388_p3), %s302_s4, 4294967168  ;;  %p12_p4 = scmp.ge.s32.totalorder %s532_s15, 5   ;;  %s617_s9 = smov %s481_s10 }
 0x11f   : > { %s618_s10 = smov %s485_s11  ;;  %s619_s11 = smov %s545_s18 }
 0x120   : > { %s620_s12 = smov %s532_s15  ;;  %14 = sbr.rel (!%p12_p4) target bundleno = 3 (0x3), region = 106 }
 0x125   :  { %307 = vsyncpa [#allocation4], 1 }
 0x126   :  { %309 = vsyncpa [#allocation4 + $0x1], 1 }

// kernel: mutan_forward.2
= control target key start
LH: loop header
LB: loop body
LE: loop exit
PB: predicated region body
PF: predicated region fallthrough
CT: control target
= control target key end

     0   :  { %s640_s21 = smov 0   ;;  %s709_s0 = inlined_call_operand.vmem [shape: f32[8,32], index: 0, kind: input, shape index: {}]   ;;  %s710_s1 = inlined_call_operand.vmem [shape: f32[8,32], index: 1, kind: input, shape index: {}]   ;;  %s711_s2 = inlined_call_operand.vmem [shape: f32[5,32,32], index: 2, kind: input, shape index: {}]   ;;  %s712_s3 = inlined_call_operand.vmem [shape: f32[5,1,32], index: 3, kind: input, shape index: {}]   ;;  %s713_s4 = inlined_call_operand.vmem [shape: f32[5,32,32], index: 4, kind: input, shape index: {}]   ;;  %s714_s5 = inlined_call_operand.vmem [shape: f32[5,1,32], index: 5, kind: input, shape index: {}]   ;;  %s715_s6 = inlined_call_operand.vmem [shape: f32[8,32], index: 6, kind: output, shape index: {}]  }
   0x1 LB: > { %s646_s22 = sadd.s32 4294967295, %s600_s21   ;;  %p536_p0 = scmp.ge.s32.totalorder %s600_s21, 1  ;;  %s600_s21 = sphi %s640_s21, %s16_s21  }
   0x2   : > { %p233_p1 = scmp.lt.s32.totalorder %s600_s21, 6 }
   0x4   : > { %p234_p2 = pnand %p536_p0, %p233_p1 }
   0x5   : > { %p269_p3 = scmp.lt.s32.totalorder (!%p234_p2), %s646_s22, 4  ;;  %p541_p4 = scmp.ne.s32.totalorder (!%p234_p2), %s646_s22, 0 }
   0x6   : > { %237 = sbr.rel (%p234_p2) target bundleno = 241 (0xf1), region = 44 }
   0xb   : > { %s652_s23 = scalar_select %p269_p3, %s646_s22, 4 }
   0xc   : > { %288 = sbr.rel (%p541_p4) target bundleno = 19 (0x13), region = 48 }
   0xd   : > { %s549_s24 = sshll.u32 %s652_s23, 5  ;;  %s276_s27 = scalar_lea.vmem %s712_s3, %s652_s23 }
   0xe   : > { %s273_s30 = scalar_lea.vmem %s711_s2, %s549_s24  ;;  %s281_s9 = scalar_lea.vmem %s713_s4, %s549_s24 }
   0xf   : > { %s284_s12 = scalar_lea.vmem %s714_s5, %s652_s23 }
  0x11   : > { %vm289_vm0 = vcmask 261120   ;;  %v602_v0 = vmov 0.0  }
  0x12   : > { %290 = vst.msk [vmem:[%s715_s6] sm:$0xff] %vm289_vm0, %v602_v0 }
  0x13 PF: > { %v296_v1 = vld [vmem:[%s273_s30 + $0x18] sm:$0xff]  ;;  %v603_v3 = vmov 0.0   ;;  %v295_v4 = vld [vmem:[%s273_s30 + $0x10] sm:$0xff]  ;;  %v294_v6 = vld [vmem:[%s273_s30 + $0x8] sm:$0xff]  ;;  %vm304_vm1 = vcmask 261120   ;;  %vm604_vm2 = vmmov 0  }
  0x14   : > { %v382_v2 = vld [vmem:[%s281_s9 + $0x18] sm:$0xff]  ;;  %561 = vmatprep.subr.mxu0 %v603_v3  ;;  %572 = vmatprep.subr.mxu1 %v603_v3  ;;  %v381_v5 = vld [vmem:[%s281_s9 + $0x10] sm:$0xff]  ;;  %v380_v7 = vld [vmem:[%s281_s9 + $0x8] sm:$0xff]  ;;  %p546_p5 = scmp.ne.s32.totalorder %s646_s22, 4 }
  0x15   : > { %562 = vmatpush3.msra.mxu0 %v296_v1  ;;  %573 = vmatpush3.msra.mxu1 %v382_v2  ;;  %v293_v8 = vld [vmem:[%s273_s30] sm:$0xff] }
  0x16   : > { %563 = vmatprep.subr.mxu0 %v603_v3  ;;  %574 = vmatprep.subr.mxu1 %v603_v3  ;;  %v379_v9 = vld [vmem:[%s281_s9] sm:$0xff] }
  0x17   : > { %564 = vmatpush3.msra.mxu0 %v295_v4  ;;  %575 = vmatpush3.msra.mxu1 %v381_v5  ;;  %v291_v10 = vld [vmem:[%s709_s0] sm:$0xff] }
  0x18   : > { %565 = vmatprep.subr.mxu0 %v603_v3  ;;  %576 = vmatprep.subr.mxu1 %v603_v3  ;;  %v292_v11 = vld [vmem:[%s710_s1] sm:$0xff] }
  0x19   : > { %566 = vmatpush3.msra.mxu0 %v294_v6  ;;  %577 = vmatpush3.msra.mxu1 %v380_v7  ;;  %v542_v12 = vld [vmem:[%s276_s27] ss:$0 sm:$0xff] }
  0x1a   : > { %567 = vmatprep.subr.mxu0 %v603_v3  ;;  %578 = vmatprep.subr.mxu1 %v603_v3  ;;  %v544_v13 = vld [vmem:[%s284_s12] ss:$0 sm:$0xff] }
  0x1b   : > { %568 = vmatpush3.msra.mxu0 %v293_v8  ;;  %569 = vmatprep.mubr.msk.f32.mxu0 %vm604_vm2, %v603_v3  ;;  %v464_v22 = vld [vmem:[%s715_s6] sm:$0xff] }
  0x1c   : > { %579 = vmatpush3.msra.mxu1 %v379_v9  ;;  %580 = vmatprep.mubr.msk.f32.mxu1 %vm604_vm2, %v603_v3 }
  0x1d   : > { %570 = vmatmul.mubr.msk.f32.vlgmr.msra.gmra.mxu0 %vm304_vm1, %v291_v10  ;;  %581 = vmatmul.mubr.msk.f32.vlgmr.msra.gmra.mxu1 %vm304_vm1, %v292_v11 }
  0xdd   : > { %v374_v14 = vpop.f32.mrf.mxu0  ;;  %v459_v15 = vpop.f32.mrf.mxu1 }
  0xde   : > { %v375_v16 = vadd.f32 %v542_v12, %v374_v14  ;;  %v460_v17 = vadd.f32 %v544_v13, %v459_v15 }
  0xdf   : > { %v571_v18 = vpop.f32.mrf.mxu0  ;;  %v582_v19 = vpop.f32.mrf.mxu1 }
  0xe0   : > { %v378_v20 = vmax.f32 %v375_v16, 0.0  ;;  %v463_v21 = vmax.f32 %v460_v17, 0.0 }
  0xe2   : > { %v465_v23 = vmul.f32 %v463_v21, %v378_v20  ;;  %471 = sbr.rel (%p546_p5) target bundleno = 241 (0xf1), region = 52 }
  0xe4   : > { %v466_v24 = vadd.f32 %v465_v23, %v464_v22 }
  0xe6   : > { %467 = vst.msk [vmem:[%s715_s6] sm:$0xff] %vm304_vm1, %v466_v24 }
  0xed   : > { %v472_v25 = vld [vmem:[%s715_s6] sm:$0xff] }
  0xee   : > { %v473_v26 = vmax.f32 %v472_v25, 0.0 }
  0xf0   : > { %474 = vst.msk [vmem:[%s715_s6] sm:$0xff] %vm304_vm1, %v473_v26 }
  0xf1 PF: > { %s16_s21 = sadd.s32 1, %s600_s21  }
  0xf2   : > { %p13_p6 = scmp.ge.s32.totalorder %s16_s21, 7  }
  0xf4   :  { %15 = sbr.rel (!%p13_p6) target bundleno = 1 (0x1), region = 87 }

</bundles_post_ra>
